<compile_context>
chip_gen: v7x
topology: tpu7x:2x2x1
jax: 0.10.0
libtpu: 0.0.40
codegen_flags: <defaults>
</compile_context>

<pallas_src>
import jax
import jax.numpy as jnp
from jax.experimental import pallas as pl
from jax.experimental.pallas import tpu as pltpu


def _leaky_relu(x, slope=0.01):
    return jnp.where(x > 0, x, slope * x)


def _round_up(n, m):
    return ((n + m - 1) // m) * m


def mlp_kernel(x_ref,
               w1_ref, b1_ref,
               w2_ref, b2_ref,
               w3_ref, b3_ref,
               w4_ref, b4_ref,
               o_ref):
    """One batch tile of the fused MLP in transposed (F, B) layout.

    All matmuls are bf16 x bf16 with f32 accumulation (single-pass MXU);
    bias add + LeakyReLU run in f32 on the VPU.
    """
    f32 = jnp.float32
    bf16 = jnp.bfloat16

    x = x_ref[...]                                                            # (5, TB) bf16

    h = jnp.dot(w1_ref[...], x, preferred_element_type=f32) + b1_ref[...]     # (10, TB) f32
    h = _leaky_relu(h)
    # TODO(synk): nn.Dropout(p=0.5) is identity in eval mode; training-mode masking omitted.

    h = jnp.dot(w2_ref[...], h.astype(bf16),
                preferred_element_type=f32) + b2_ref[...]                     # (20, TB) f32
    h = _leaky_relu(h)

    h = jnp.dot(w3_ref[...], h.astype(bf16),
                preferred_element_type=f32) + b3_ref[...]                     # (15, TB) f32
    h = _leaky_relu(h)

    out = jnp.dot(w4_ref[...], h.astype(bf16),
                  preferred_element_type=f32) + b4_ref[...]                   # (1, TB) f32
    o_ref[...] = out.astype(o_ref.dtype)                                      # lane-dense store


def _choose_tile(B, tile_b):
    """Batch tile: multiple of 128, big enough to amortize the ~0.35us/step
    pipeline overhead, capped at 32768 for VMEM headroom (v7x: 64 MiB phys),
    and sized so the grid has >=2 tiles when B allows it (v7x megacore)."""
    TB = _round_up(min(tile_b, 32768), 128)
    B_ceil = _round_up(B, 128)
    if B_ceil >= 256:                                # room for at least 2 tiles
        TB = min(TB, _round_up(pl.cdiv(B, 2), 128))
    return max(128, min(TB, B_ceil))


def classificator_forward_t(xt, params, tile_b=8192):
    """Fast path: xt is already (5, B) bf16 (batch on the 128-lane axis)."""
    F, B = xt.shape
    assert F == 5, F

    TB = _choose_tile(B, tile_b)
    nb = pl.cdiv(B, TB)                              # Pallas handles the ragged edge tile

    w1, w2, w3, w4 = (params[f"w{i}"].astype(jnp.bfloat16) for i in (1, 2, 3, 4))
    b1, b2, b3, b4 = (params[f"b{i}"].astype(jnp.float32) for i in (1, 2, 3, 4))

    # Weights/biases: single full-extent block, constant index_map -> VMEM-resident.
    full = lambda a: pl.BlockSpec(a.shape, lambda i: (0,) * a.ndim)

    flops = 2 * B * (5 * 10 + 10 * 20 + 20 * 15 + 15 * 1)
    param_bytes = sum(int(a.size) * a.dtype.itemsize
                      for a in (w1, b1, w2, b2, w3, b3, w4, b4))
    # Constant index_maps => params are DMA'd once (not nb times).
    bytes_accessed = int(xt.size) * 2 + B * 4 + param_bytes

    out_t = pl.pallas_call(
        mlp_kernel,
        out_shape=jax.ShapeDtypeStruct((1, B), jnp.float32),
        grid=(nb,),
        in_specs=[pl.BlockSpec((5, TB), lambda i: (0, i)),    # batch-tiled input
                  full(w1), full(b1),
                  full(w2), full(b2),
                  full(w3), full(b3),
                  full(w4), full(b4)],
        out_specs=pl.BlockSpec((1, TB), lambda i: (0, i)),     # lane-dense output tile
        compiler_params=pltpu.CompilerParams(
            dimension_semantics=("parallel",)),
        cost_estimate=pl.CostEstimate(flops=flops,
                                      transcendentals=0,
                                      bytes_accessed=bytes_accessed),
    )(xt, w1, b1, w2, b2, w3, b3, w4, b4)
    return out_t


def classificator_forward(x, params, tile_b=8192):
    """x: (B, 5) float32 (PyTorch layout).  Returns (B, 1) float32."""
    B, F = x.shape
    assert F == 5, F
    # Layout plumbing (one extra XLA pass over x).  Callers that can provide
    # (5, B) bf16 directly should call classificator_forward_t to skip it.
    xt = x.T.astype(jnp.bfloat16)
    out_t = classificator_forward_t(xt, params, tile_b=tile_b)
    return out_t[0, :B].reshape(B, 1)


def init_params(key):
    """Deterministic init mirroring nn.Linear: weights (out, in), biases (out, 1)."""
    dims = [(5, 10), (10, 20), (20, 15), (15, 1)]
    params = {}
    for i, (fan_in, fan_out) in enumerate(dims, start=1):
        key, kw, kb = jax.random.split(key, 3)
        bound = 1.0 / (fan_in ** 0.5)   # PyTorch Linear default U(-1/sqrt(in), 1/sqrt(in))
        params[f"w{i}"] = jax.random.uniform(
            kw, (fan_out, fan_in), jnp.float32, minval=-bound, maxval=bound)
        params[f"b{i}"] = jax.random.uniform(
            kb, (fan_out, 1), jnp.float32, minval=-bound, maxval=bound)
    return params


def reference_forward(x, params):
    """Pure-JAX reference mirroring the kernel's bf16 MXU quantization
    (bf16 x bf16 dots with f32 accumulation, bias/LeakyReLU in f32)."""
    h = x.astype(jnp.bfloat16)
    for i in (1, 2, 3):
        w = params[f"w{i}"].astype(jnp.bfloat16)
        z = jnp.dot(h, w.T, preferred_element_type=jnp.float32) \
            + params[f"b{i}"].reshape(1, -1)
        z = jnp.where(z > 0, z, 0.01 * z)
        h = z.astype(jnp.bfloat16)
    w4 = params["w4"].astype(jnp.bfloat16)
    return jnp.dot(h, w4.T, preferred_element_type=jnp.float32) \
        + params["b4"].reshape(1, -1)


if __name__ == "__main__":
    key = jax.random.PRNGKey(0)
    key, kx = jax.random.split(key)

    B = 200                                   # ragged batch: 2 tiles + partial edge block
    x = jax.random.normal(kx, (B, 5), dtype=jnp.float32)
    params = init_params(key)

    out = jax.block_until_ready(classificator_forward(x, params))

    ref = reference_forward(x, params)
    assert out.shape == (B, 1), out.shape
    max_err = float(jnp.abs(out - ref).max())
    assert jnp.allclose(out, ref, atol=1e-3, rtol=1e-3), max_err

    print("KERNEL_OK")
</pallas_src>

<mosaic_0001>
module attributes {stable_mosaic.version = 11 : i64} {
  func.func @mlp_kernel(%arg0: i32, %arg1: memref<5x128xbf16, #tpu.memory_space<vmem>>, %arg2: memref<10x5xbf16, #tpu.memory_space<vmem>>, %arg3: memref<10x1xf32, #tpu.memory_space<vmem>>, %arg4: memref<20x10xbf16, #tpu.memory_space<vmem>>, %arg5: memref<20x1xf32, #tpu.memory_space<vmem>>, %arg6: memref<15x20xbf16, #tpu.memory_space<vmem>>, %arg7: memref<15x1xf32, #tpu.memory_space<vmem>>, %arg8: memref<1x15xbf16, #tpu.memory_space<vmem>>, %arg9: memref<1x1xf32, #tpu.memory_space<vmem>>, %arg10: memref<1x128xf32, #tpu.memory_space<vmem>>) attributes {dimension_semantics = [#tpu.dimension_semantics<parallel>], iteration_bounds = array<i64: 2>, scalar_prefetch = 0 : i64, scratch_operands = 0 : i64, tpu.core_type = #tpu.core_type<tc>, window_params = [{transform_indices = @transform_0, window_bounds = array<i64: 5, 128>}, {pipeline_mode = #tpu.pipeline_mode<synchronous>, transform_indices = @transform_1, window_bounds = array<i64: 10, 5>}, {pipeline_mode = #tpu.pipeline_mode<synchronous>, transform_indices = @transform_2, window_bounds = array<i64: 10, 1>}, {pipeline_mode = #tpu.pipeline_mode<synchronous>, transform_indices = @transform_3, window_bounds = array<i64: 20, 10>}, {pipeline_mode = #tpu.pipeline_mode<synchronous>, transform_indices = @transform_4, window_bounds = array<i64: 20, 1>}, {pipeline_mode = #tpu.pipeline_mode<synchronous>, transform_indices = @transform_5, window_bounds = array<i64: 15, 20>}, {pipeline_mode = #tpu.pipeline_mode<synchronous>, transform_indices = @transform_6, window_bounds = array<i64: 15, 1>}, {pipeline_mode = #tpu.pipeline_mode<synchronous>, transform_indices = @transform_7, window_bounds = array<i64: 1, 15>}, {pipeline_mode = #tpu.pipeline_mode<synchronous>, transform_indices = @transform_8, window_bounds = array<i64: 1, 1>}, {transform_indices = @transform_9, window_bounds = array<i64: 1, 128>}]} {
    %c0 = arith.constant 0 : index
    %c0_0 = arith.constant 0 : index
    %0 = vector.load %arg1[%c0, %c0_0] : memref<5x128xbf16, #tpu.memory_space<vmem>>, vector<5x128xbf16>
    %c0_1 = arith.constant 0 : index
    %c0_2 = arith.constant 0 : index
    %1 = vector.load %arg2[%c0_1, %c0_2] : memref<10x5xbf16, #tpu.memory_space<vmem>>, vector<10x5xbf16>
    %cst = arith.constant dense<0.000000e+00> : vector<10x128xf32>
    %2 = tpu.matmul %1, %0, %cst {dimension_numbers = #tpu.dot_dimension_numbers<[1], [0], [0], [1], [0, 0, 1, 1], [], []>} : vector<10x5xbf16>, vector<5x128xbf16>, vector<10x128xf32> -> vector<10x128xf32>
    %c0_3 = arith.constant 0 : index
    %c0_4 = arith.constant 0 : index
    %3 = vector.load %arg3[%c0_3, %c0_4] : memref<10x1xf32, #tpu.memory_space<vmem>>, vector<10x1xf32>
    %4 = vector.broadcast %3 : vector<10x1xf32> to vector<10x128xf32>
    %5 = arith.addf %2, %4 : vector<10x128xf32>
    %cst_5 = arith.constant 0.000000e+00 : f32
    %6 = vector.broadcast %cst_5 : f32 to vector<10x128xf32>
    %7 = arith.cmpf ogt, %5, %6 : vector<10x128xf32>
    %cst_6 = arith.constant 0.00999999977 : f32
    %8 = vector.broadcast %cst_6 : f32 to vector<10x128xf32>
    %9 = arith.mulf %8, %5 : vector<10x128xf32>
    %10 = arith.select %7, %5, %9 : vector<10x128xi1>, vector<10x128xf32>
    %c0_7 = arith.constant 0 : index
    %c0_8 = arith.constant 0 : index
    %11 = vector.load %arg4[%c0_7, %c0_8] : memref<20x10xbf16, #tpu.memory_space<vmem>>, vector<20x10xbf16>
    %12 = arith.truncf %10 : vector<10x128xf32> to vector<10x128xbf16>
    %cst_9 = arith.constant dense<0.000000e+00> : vector<20x128xf32>
    %13 = tpu.matmul %11, %12, %cst_9 {dimension_numbers = #tpu.dot_dimension_numbers<[1], [0], [0], [1], [0, 0, 1, 1], [], []>} : vector<20x10xbf16>, vector<10x128xbf16>, vector<20x128xf32> -> vector<20x128xf32>
    %c0_10 = arith.constant 0 : index
    %c0_11 = arith.constant 0 : index
    %14 = vector.load %arg5[%c0_10, %c0_11] : memref<20x1xf32, #tpu.memory_space<vmem>>, vector<20x1xf32>
    %15 = vector.broadcast %14 : vector<20x1xf32> to vector<20x128xf32>
    %16 = arith.addf %13, %15 : vector<20x128xf32>
    %cst_12 = arith.constant 0.000000e+00 : f32
    %17 = vector.broadcast %cst_12 : f32 to vector<20x128xf32>
    %18 = arith.cmpf ogt, %16, %17 : vector<20x128xf32>
    %cst_13 = arith.constant 0.00999999977 : f32
    %19 = vector.broadcast %cst_13 : f32 to vector<20x128xf32>
    %20 = arith.mulf %19, %16 : vector<20x128xf32>
    %21 = arith.select %18, %16, %20 : vector<20x128xi1>, vector<20x128xf32>
    %c0_14 = arith.constant 0 : index
    %c0_15 = arith.constant 0 : index
    %22 = vector.load %arg6[%c0_14, %c0_15] : memref<15x20xbf16, #tpu.memory_space<vmem>>, vector<15x20xbf16>
    %23 = arith.truncf %21 : vector<20x128xf32> to vector<20x128xbf16>
    %cst_16 = arith.constant dense<0.000000e+00> : vector<15x128xf32>
    %24 = tpu.matmul %22, %23, %cst_16 {dimension_numbers = #tpu.dot_dimension_numbers<[1], [0], [0], [1], [0, 0, 1, 1], [], []>} : vector<15x20xbf16>, vector<20x128xbf16>, vector<15x128xf32> -> vector<15x128xf32>
    %c0_17 = arith.constant 0 : index
    %c0_18 = arith.constant 0 : index
    %25 = vector.load %arg7[%c0_17, %c0_18] : memref<15x1xf32, #tpu.memory_space<vmem>>, vector<15x1xf32>
    %26 = vector.broadcast %25 : vector<15x1xf32> to vector<15x128xf32>
    %27 = arith.addf %24, %26 : vector<15x128xf32>
    %cst_19 = arith.constant 0.000000e+00 : f32
    %28 = vector.broadcast %cst_19 : f32 to vector<15x128xf32>
    %29 = arith.cmpf ogt, %27, %28 : vector<15x128xf32>
    %cst_20 = arith.constant 0.00999999977 : f32
    %30 = vector.broadcast %cst_20 : f32 to vector<15x128xf32>
    %31 = arith.mulf %30, %27 : vector<15x128xf32>
    %32 = arith.select %29, %27, %31 : vector<15x128xi1>, vector<15x128xf32>
    %c0_21 = arith.constant 0 : index
    %c0_22 = arith.constant 0 : index
    %33 = vector.load %arg8[%c0_21, %c0_22] : memref<1x15xbf16, #tpu.memory_space<vmem>>, vector<1x15xbf16>
    %34 = arith.truncf %32 : vector<15x128xf32> to vector<15x128xbf16>
    %cst_23 = arith.constant dense<0.000000e+00> : vector<1x128xf32>
    %35 = tpu.matmul %33, %34, %cst_23 {dimension_numbers = #tpu.dot_dimension_numbers<[1], [0], [0], [1], [0, 0, 1, 1], [], []>} : vector<1x15xbf16>, vector<15x128xbf16>, vector<1x128xf32> -> vector<1x128xf32>
    %c0_24 = arith.constant 0 : index
    %c0_25 = arith.constant 0 : index
    %36 = vector.load %arg9[%c0_24, %c0_25] : memref<1x1xf32, #tpu.memory_space<vmem>>, vector<1x1xf32>
    %37 = vector.broadcast %36 : vector<1x1xf32> to vector<1x128xf32>
    %38 = arith.addf %35, %37 : vector<1x128xf32>
    %c0_26 = arith.constant 0 : index
    %c0_27 = arith.constant 0 : index
    %39 = vector.load %arg10[%c0_26, %c0_27] : memref<1x128xf32, #tpu.memory_space<vmem>>, vector<1x128xf32>
    tpu.vector_store %arg10[%c0_26, %c0_27], %38 {strides = array<i32>} : memref<1x128xf32, #tpu.memory_space<vmem>>, vector<1x128xf32>,
    return
  }
  func.func @transform_0(%arg0: i32) -> (i32, i32) {
    %c0_i32 = arith.constant 0 : i32
    %c0_i32_0 = arith.constant 0 : i32
    return %c0_i32, %arg0 : i32, i32
  }
  func.func @transform_1(%arg0: i32) -> (i32, i32) {
    %c0_i32 = arith.constant 0 : i32
    %c0_i32_0 = arith.constant 0 : i32
    %c0_i32_1 = arith.constant 0 : i32
    return %c0_i32, %c0_i32_0 : i32, i32
  }
  func.func @transform_2(%arg0: i32) -> (i32, i32) {
    %c0_i32 = arith.constant 0 : i32
    %c0_i32_0 = arith.constant 0 : i32
    %c0_i32_1 = arith.constant 0 : i32
    return %c0_i32, %c0_i32_0 : i32, i32
  }
  func.func @transform_3(%arg0: i32) -> (i32, i32) {
    %c0_i32 = arith.constant 0 : i32
    %c0_i32_0 = arith.constant 0 : i32
    %c0_i32_1 = arith.constant 0 : i32
    return %c0_i32, %c0_i32_0 : i32, i32
  }
  func.func @transform_4(%arg0: i32) -> (i32, i32) {
    %c0_i32 = arith.constant 0 : i32
    %c0_i32_0 = arith.constant 0 : i32
    %c0_i32_1 = arith.constant 0 : i32
    return %c0_i32, %c0_i32_0 : i32, i32
  }
  func.func @transform_5(%arg0: i32) -> (i32, i32) {
    %c0_i32 = arith.constant 0 : i32
    %c0_i32_0 = arith.constant 0 : i32
    %c0_i32_1 = arith.constant 0 : i32
    return %c0_i32, %c0_i32_0 : i32, i32
  }
  func.func @transform_6(%arg0: i32) -> (i32, i32) {
    %c0_i32 = arith.constant 0 : i32
    %c0_i32_0 = arith.constant 0 : i32
    %c0_i32_1 = arith.constant 0 : i32
    return %c0_i32, %c0_i32_0 : i32, i32
  }
  func.func @transform_7(%arg0: i32) -> (i32, i32) {
    %c0_i32 = arith.constant 0 : i32
    %c0_i32_0 = arith.constant 0 : i32
    %c0_i32_1 = arith.constant 0 : i32
    return %c0_i32, %c0_i32_0 : i32, i32
  }
  func.func @transform_8(%arg0: i32) -> (i32, i32) {
    %c0_i32 = arith.constant 0 : i32
    %c0_i32_0 = arith.constant 0 : i32
    %c0_i32_1 = arith.constant 0 : i32
    return %c0_i32, %c0_i32_0 : i32, i32
  }
  func.func @transform_9(%arg0: i32) -> (i32, i32) {
    %c0_i32 = arith.constant 0 : i32
    %c0_i32_0 = arith.constant 0 : i32
    return %c0_i32, %arg0 : i32, i32
  }
}

</mosaic_0001>

<bundles_post_ra>
// kernel: tpu_custom_call.1
= control target key start
LH: loop header
LB: loop body
LE: loop exit
PB: predicated region body
PF: predicated region fallthrough
CT: control target
= control target key end

     0   :  { %s1090_s0 = inlined_call_operand.vmem [shape: bf16[5,200], index: 0, kind: input, shape index: {}]   ;;  %s1091_s1 = inlined_call_operand.vmem [shape: bf16[10,5], index: 1, kind: input, shape index: {}]   ;;  %s1092_s2 = inlined_call_operand.vmem [shape: f32[10,1], index: 2, kind: input, shape index: {}]   ;;  %s1093_s3 = inlined_call_operand.vmem [shape: bf16[20,10], index: 3, kind: input, shape index: {}]   ;;  %s1094_s4 = inlined_call_operand.vmem [shape: f32[20,1], index: 4, kind: input, shape index: {}]   ;;  %s1095_s5 = inlined_call_operand.vmem [shape: bf16[15,20], index: 5, kind: input, shape index: {}]   ;;  %s1096_s6 = inlined_call_operand.vmem [shape: f32[15,1], index: 6, kind: input, shape index: {}]   ;;  %s1097_s7 = inlined_call_operand.vmem [shape: bf16[1,15], index: 7, kind: input, shape index: {}]   ;;  %s1098_s8 = inlined_call_operand.<no memory space> [shape: f32[1,1], index: 8, kind: input, shape index: {}]   ;;  %s1099_s9 = inlined_call_operand.hbm [shape: f32[1,200], index: 9, kind: output, shape index: {}]  }
   0x1   :  { %v14_v0 = vstv %s1098_s8 }
   0x2   :  { %15 = vst [vmem:[#allocation2] sm:$0x1] %v14_v0 }
   0x3   :  { %16 = vsyncpa [#allocation4], 0 }
   0x4   :  { %18 = vsyncpa [#allocation4 + $0x1], 0  ;;  %s938_s11 = smov 0   ;;  %s940_s12 = smov 0  }
   0x5   :  { %s942_s13 = smov 0   ;;  %s944_s14 = smov 0  }
   0x6 LB: > { %s959_s8 = sadd.s32 4294967295, %s878_s14   ;;  %s713_s15 = sadd.s32 4294967294, %s878_s14   ;;  %s878_s14 = sphi %s944_s14, %s1105_s14   ;;  %s874_s13 = sphi %s942_s13, %s1104_s13   ;;  %s870_s12 = sphi %s940_s12, %s1103_s12   ;;  %s866_s11 = sphi %s938_s11, %s1102_s11  }
   0x7   : > { %s963_s16 = sadd.s32 1, %s878_s14   ;;  %s225_s17 = sadd.s32 1, %s874_s13 }
   0x8   : > { %s222_s18 = ssub.s32 %s878_s14, %s963_s16  ;;  %p235_p0 = scmp.ne.s32.totalorder %s874_s13, %s870_s12 }
   0x9   : > { %p223_p1 = scmp.eq.s32.totalorder %s222_s18, 0  ;;  %p236_p2 = scmp.eq.s32.totalorder %s959_s8, 1 }
   0xa   : > { %p241_p3 = scmp.ne.s32.totalorder %s870_s12, %s866_s11  ;;  %p242_p4 = scmp.eq.s32.totalorder %s713_s15, 1 }
   0xb   : > { %s974_s19 = scalar_select %p223_p1, %s874_s13, %s225_s17  }
   0xc   : > { %p976_p5 = por %p236_p2, %p235_p0  ;;  %p980_p6 = por %p242_p4, %p241_p3 }
   0xd   : > { %p716_p7 = scmp.ge.s32.totalorder %s878_s14, 1  ;;  %p291_p8 = scmp.lt.s32.totalorder %s878_s14, 3 }
   0xf   : > { %p292_p9 = pnand %p716_p7, %p291_p8 }
  0x10   : > { %p325_p10 = scmp.lt.s32.totalorder (!%p292_p9), %s959_s8, 1  ;;  %vm354_vm0 = vcmask (!%p292_p9), 1041408   ;;  %v880_v1 = vmov (!%p292_p9), 0.0   ;;  %vm355_vm1 = vcmask (!%p292_p9), 1042432   ;;  %v881_v2 = vmov (!%p292_p9), 65535   ;;  %v333_v4 = vld [vmem:[%s1092_s2] sm:$0xff] (!%p292_p9) }
  0x11   : > { %295 = sbr.rel (%p292_p9) target bundleno = 942 (0x3ae), region = 56  ;;  %740 = vmatprep.subr.bf16.mxu0 (!%p292_p9), %v880_v1  ;;  %v356_v3 = vsel (!%p292_p9), %vm354_vm0, 4294967295, %v881_v2  ;;  %vm882_vm2 = vmmov (!%p292_p9), 0   ;;  %v883_v6 = vmov (!%p292_p9), 0   ;;  %v334_v7 = vld [vmem:[%s1092_s2 + $0x8] sm:$0x3] (!%p292_p9) }
  0x12   : > { %742 = vmatprep.mubr.msk.bf16.mxu0 (!%p292_p9), %vm882_vm2, %v880_v1  ;;  %v357_v5 = vsel (!%p292_p9), %vm355_vm1, %v356_v3, 0  ;;  %810 = vset.pattern.permute.xlu0 (!%p292_p9), %v883_v6  ;;  %v812_v10 = vld [vmem:[%s1091_s1] sm:$0x1f] (!%p292_p9)   ;;  %vm350_vm3 = vcmask (!%p292_p9), 39936   ;;  %v414_v11 = vld [vmem:[%s1094_s4 + $0x10] sm:$0xf] (!%p292_p9) }
  0x13   : > { %811 = vset.pattern.permute.xlu1 (!%p292_p9), %v883_v6  ;;  %337 = vperm.xlu0 (!%p292_p9), %810, %v333_v4   ;;  %v511_v12 = vld [vmem:[%s1096_s6 + $0x8] sm:$0x7f] (!%p292_p9)  ;;  %v813_v13 = vld [vmem:[%s1093_s3] sm:$0xff] (!%p292_p9)   ;;  %vm438_vm4 = vcmask (!%p292_p9), 80896   ;;  %vm445_vm7 = vcmask (!%p292_p9), 1044480   ;;  %vm527_vm11 = vcmask (!%p292_p9), 162816  }
  0x14   : > { %748 = vmatprep.mubr.msk.bf16.mxu1 (!%p292_p9), %vm438_vm4, %v813_v13  ;;  %v412_v14 = vld [vmem:[%s1094_s4] sm:$0xff] (!%p292_p9)  ;;  %v413_v15 = vld [vmem:[%s1094_s4 + $0x8] sm:$0xff] (!%p292_p9)  ;;  %vm597_vm12 = vcmask (!%p292_p9), 1046528   ;;  %vm598_vm13 = vcmask (!%p292_p9), 1047552   ;;  %s727_s26 = sshll.u32 (!%p292_p9), %s959_s8, 4  ;;  %s884_s17 = smov (!%p292_p9), [#allocation3]  }
  0x15   : > { %417 = vperm.xlu1 (!%p292_p9), %811, %v412_v14   ;;  %v510_v16 = vld [vmem:[%s1096_s6] sm:$0xff] (!%p292_p9)  ;;  %v814_v32 = vld [vmem:[%s1093_s3 + $0x8] ss:$0 sps:$4 sm:$0x33] (!%p292_p9)   ;;  %v599_v62 = vsel (!%p292_p9), %vm597_vm12, 4294967295, %v881_v2  ;;  %s1048_s10 = scalar_lea.hbm (!%p292_p9), %s1099_s9, %s727_s26  ;;  %s820_s18 = sshll.u32 (!%p292_p9), %s884_s17, 4  ;;  %s821_s18 = int_to_ptr.vmem [resolvable:$false] %s820_s18 }
  0x16   : > { %v583_v17 = vld [vmem:[#allocation2] sm:$0x1] (!%p292_p9)  ;;  %v600_v0 = vsel (!%p292_p9), %vm598_vm13, %v599_v62, 0 }
  0x17   : > { %342 = vperm.xlu0 (!%p292_p9), %810, %v334_v7   ;;  %v815_v52 = vld [vmem:[%s1095_s5] sm:$0xff] (!%p292_p9)   ;;  %v589_v7 = vlaneseq (!%p292_p9) }
  0x18   : > { %s326_s22 = scalar_select %p325_p10, %s959_s8, 1  ;;  %v581_v6 = vld [vmem:[%s1097_s7] sm:$0x1] }
  0x19   : > { %422 = vperm.xlu1 %811, %v413_v15  }
  0x1a   : > { %s717_s25 = sshll.u32 %s326_s22, 2  ;;  %s822_s22 = scalar_lea.vmem %s821_s18, 32 }
  0x1b   : > { %s328_s30 = scalar_lea.vmem %s1090_s0, %s717_s25  ;;  %427 = vperm.xlu0 %810, %v414_v11   ;;  %s323_s25 = sand.u32 1, %s870_s12  }
  0x1c   : > { %v330_v8 = vld [vmem:[%s328_s30] sm:$0x7]  ;;  %s324_s27 = scalar_lea.vmem [#allocation3], %s323_s25  ;;  %s646_s8 = scalar_lea.sflag [#allocation4], %s323_s25 }
  0x1d   : > { %v359_v9 = vand.u32 %v357_v5, %v330_v8  ;;  %514 = vperm.xlu1 %811, %v510_v16   ;;  %v590_v8 = vshrl.u32 %v589_v7, 7  ;;  %s658_s28 = sshll.u32 %s324_s27, 4  ;;  %s1050_s28 = int_to_ptr.vmem [resolvable:$true] %s658_s28 }
  0x1e   : > { %s816_s15 = scalar_lea.vmem %s1050_s28, 16  ;;  %p823_p0 = scmp.lt.s32.totalorder %s1050_s28, %s821_s18 }
  0x1f   : > { %741 = vmatpush3.bf16.msra.mxu0 %v359_v9  ;;  %519 = vperm.xlu0 %810, %v511_v12   ;;  %v591_v2 = vsub.s32 0, %v590_v8  ;;  %p817_p11 = scmp.ne.s32.totalorder %s1050_s28, %s816_s15  ;;  %p824_p1 = scmp.lt.s32.totalorder %s822_s22, %s816_s15 }
  0x20   : > { %752 = vmatprep.subr.bf16.mxu0 %v880_v1 }
  0x21   : > { %586 = vperm.xlu1 %811, %v583_v17   ;;  %p818_p12 = pnand %p817_p11, %p976_p5  ;;  %p825_p2 = por %p824_p1, %p823_p0 }
  0x22   : > { %743 = vmatmul.mubr.msk.bf16.vlgmr.msra.gmra.mrb[0].mxu0 %vm350_vm3, %v812_v10 }
  0x23   : > { %756 = vmatprep.mubr.msk.bf16.mxu0 %vm882_vm2, %v880_v1  ;;  %p819_p13 = pneg %p818_p12 }
  0x25   : > { %p826_p3 = pnand %p825_p2, %p819_p13 }
  0x92   : > { %v338_v18 = vpop.permute.xlu0 %337 }
  0x94   : > { %v418_v33 = vpop.permute.xlu1 %417 }
  0x96   : > { %v343_v22 = vpop.permute.xlu0 %342 }
  0x98   : > { %v423_v40 = vpop.permute.xlu1 %422 }
  0x9a   : > { %v428_v34 = vpop.permute.xlu0 %427 }
  0x9c   : > { %v515_v53 = vpop.permute.xlu1 %514 }
  0x9e   : > { %v520_v57 = vpop.permute.xlu0 %519 }
  0xa0   : > { %v587_v9 = vpop.permute.xlu1 %586 }
  0xa1   : > { %v592_v10 = vrot.slane %v587_v9, %v591_v2 }
  0xf5   : > { %v395_v19 = vpop.f32.mrb[0].mxu0 }
  0xf6   : > { %v396_v20 = vadd.f32 %v395_v19, %v338_v18  ;;  %v744_v21 = vpop.f32.mrb[1].mxu0 }
  0xf7   : > { %v398_v23 = vpop.f32.mrb[2].mxu0 }
  0xf8   : > { %v404_v24 = vmul.f32 0.01, %v396_v20  ;;  %v399_v25 = vadd.f32 %v398_v23, %v343_v22  ;;  %v745_v26 = vpop.f32.mrb[3].mxu0  ;;  %vm402_vm5 = vcmp.gt.f32.partialorder %v396_v20, 0.0 }
  0xfa   : > { %v405_v27 = vmul.f32 0.01, %v399_v25  ;;  %vm403_vm6 = vcmp.gt.f32.partialorder %v399_v25, 0.0  ;;  %v406_v28 = vsel %vm402_vm5, %v396_v20, %v404_v24 }
  0xfc   : > { %v407_v29 = vsel %vm403_vm6, %v399_v25, %v405_v27 }
  0xfd   : > { %v411_v30 = vpack.c.bf16 %v407_v29, %v406_v28 }
  0xff   : > { %766 = vmatprep.subr.msk.bf16.mxu1 %vm445_vm7, %v411_v30  ;;  %v447_v31 = vsel %vm445_vm7, %v411_v30, 0 }
 0x100   : > { %747 = vmatpush3.bf16.msra.mxu1 %v447_v31 }
 0x101   : > { %760 = vmatprep.subr.bf16.mxu1 %v880_v1 }
 0x103   : > { %749 = vmatmul.mubr.msk.bf16.vlgmr.msra.gmra.mrb[0].mxu1 %vm438_vm4, %v814_v32 }
 0x104   : > { %762 = vmatprep.mubr.msk.bf16.mxu1 %vm882_vm2, %v880_v1 }
 0x1d6   : > { %v750_v35 = vpop.f32.mrb[0].mxu1 }
 0x1d7   : > { %v492_v36 = vadd.f32 %v750_v35, %v428_v34  ;;  %v483_v37 = vpop.f32.mrb[1].mxu1 }
 0x1d8   : > { %v484_v38 = vadd.f32 %v483_v37, %v418_v33  ;;  %v751_v39 = vpop.f32.mrb[2].mxu1 }
 0x1d9   : > { %v502_v41 = vmul.f32 0.01, %v492_v36  ;;  %v486_v42 = vpop.f32.mrb[3].mxu1  ;;  %vm499_vm8 = vcmp.gt.f32.partialorder %v492_v36, 0.0 }
 0x1da   : > { %v500_v43 = vmul.f32 0.01, %v484_v38  ;;  %v487_v44 = vadd.f32 %v486_v42, %v423_v40  ;;  %vm497_vm9 = vcmp.gt.f32.partialorder %v484_v38, 0.0 }
 0x1db   : > { %v505_v46 = vsel %vm499_vm8, %v492_v36, %v502_v41 }
 0x1dc   : > { %vm498_vm10 = vcmp.gt.f32.partialorder %v487_v44, 0.0  ;;  %v501_v45 = vmul.f32 0.01, %v487_v44  ;;  %v503_v47 = vsel %vm497_vm9, %v484_v38, %v500_v43  ;;  %v509_v50 = vpack.c.bf16 %v505_v46, %v505_v46 }
 0x1de   : > { %v504_v48 = vsel %vm498_vm10, %v487_v44, %v501_v45  ;;  %v532_v51 = vsel %vm354_vm0, %v509_v50, 0  ;;  %vm593_vm0 = vcmask 121856  }
 0x1df   : > { %v508_v49 = vpack.c.bf16 %v504_v48, %v503_v47 }
 0x1e1   : > { %753 = vmatpush3.bf16.msra.mxu0 %v508_v49 }
 0x1e2   : > { %754 = vmatprep.subr.bf16.mxu0 %v880_v1 }
 0x1e5   : > { %755 = vmatpush3.bf16.msra.mxu0 %v532_v51 }
 0x1e8   : > { %757 = vmatmul.mubr.msk.bf16.vlgmr.msra.gmra.mrb[4].mxu0 %vm527_vm11, %v815_v52 }
 0x2bb   : > { %v568_v54 = vpop.f32.mrb[4].mxu0 }
 0x2bc   : > { %v569_v55 = vadd.f32 %v568_v54, %v515_v53  ;;  %v758_v56 = vpop.f32.mrb[5].mxu0 }
 0x2bd   : > { %v571_v58 = vpop.f32.mrb[6].mxu0 }
 0x2be   : > { %v577_v59 = vmul.f32 0.01, %v569_v55  ;;  %v572_v60 = vadd.f32 %v571_v58, %v520_v57  ;;  %v759_v61 = vpop.f32.mrb[7].mxu0  ;;  %vm575_vm14 = vcmp.gt.f32.partialorder %v569_v55, 0.0 }
 0x2c0   : > { %vm576_vm15 = vcmp.gt.f32.partialorder %v572_v60, 0.0  ;;  %v578_v63 = vmul.f32 0.01, %v572_v60  ;;  %v579_v1 = vsel %vm575_vm14, %v569_v55, %v577_v59 }
 0x2c2   : > { %v580_v3 = vsel %vm576_vm15, %v572_v60, %v578_v63 }
 0x2c3   : > { %v582_v4 = vpack.c.bf16 %v580_v3, %v579_v1 }
 0x2c5   : > { %v602_v5 = vand.u32 %v600_v0, %v582_v4 }
 0x2c7   : > { %761 = vmatpush3.bf16.msra.mxu1 %v602_v5 }
 0x2ca   : > { %763 = vmatmul.mubr.msk.bf16.vlgmr.msra.gmra.mrb[4].mxu1 %vm593_vm0, %v581_v6 }
 0x39d   : > { %v638_v11 = vpop.f32.mrb[4].mxu1 }
 0x39e   : > { %v639_v12 = vadd.f32 %v638_v11, %v592_v10  ;;  %v764_v13 = vpop.f32.mrb[5].mxu1 }
 0x39f   : > { %v641_v14 = vpop.f32.mrb[6].mxu1 }
 0x3a0   : > { %644 = vst [vmem:[%s324_s27] sm:$0x1] %v639_v12  ;;  %v765_v15 = vpop.f32.mrb[7].mxu1 }
 0x3a1   : > { %829 = shalt.err (!%p826_p3)
}
 0x3a2   : > { %s830_s23 = scalar_lea.hbm %s1048_s10, 16  ;;  %s834_s26 = scalar_lea.hbm %s1099_s9, 32 }
 0x3a3   : > { %p831_p4 = scmp.ne.s32.totalorder %s1048_s10, %s830_s23  ;;  %p835_p9 = scmp.lt.u32.totalorder %s1048_s10, %s1099_s9 }
 0x3a4   : > { %p836_p10 = scmp.lt.u32.totalorder %s834_s26, %s830_s23  ;;  %p838_p12 = scmp.lt.u32.totalorder %s830_s23, %s1048_s10 }
 0x3a5   : > { %p832_p7 = pnand %p831_p4, %p976_p5 }
 0x3a6   : > { %p837_p11 = por %p836_p10, %p835_p9 }
 0x3a7   : > { %p833_p8 = pneg %p832_p7 }
 0x3a8   : > { %p839_p13 = por %p838_p12, %p837_p11 }
 0x3aa   : > { %p840_p0 = pnand %p839_p13, %p833_p8 }
 0x3ac   : > { %843 = shalt.err (!%p840_p0)
}
 0x3ad   : > { %767 = dma.vmem_to_hbm [thread:$0]  (%p976_p5), %s1050_s28, 16, %s1048_s10, %s646_s8  }
 0x3ae PF: > { %p773_p1 = scmp.ge.s32.totalorder %s878_s14, 2  ;;  %s670_s30 = sand.u32 1, %s866_s11  }
 0x3af   : > { %s671_s15 = scalar_lea.sflag [#allocation4], %s670_s30 }
 0x3b0   : > { %p770_p2 = pnand %p773_p1, %p980_p6 }
 0x3b2   : > { %861 = dma.done.wait (!%p770_p2), %s671_s15, 16  }
 0x3b3   : > { %863 = vsyncadd (!%p770_p2), %s671_s15, 4294967280  ;;  %p21_p3 = scmp.ge.s32.totalorder %s963_s16, 4   ;;  %s1102_s11 = smov %s870_s12 }
 0x3b4   : > { %s1103_s12 = smov %s874_s13  ;;  %s1104_s13 = smov %s974_s19 }
 0x3b5   : > { %s1105_s14 = smov %s963_s16  ;;  %23 = sbr.rel (!%p21_p3) target bundleno = 6 (0x6), region = 91 }
 0x3bc   :  { %675 = vsyncpa [#allocation4], 1 }
 0x3bd   :  { %677 = vsyncpa [#allocation4 + $0x1], 1 }

</bundles_post_ra>
